<compile_context>
chip_gen: v7x
topology: tpu7x:2x2x1
jax: 0.10.0
libtpu: 0.0.40
codegen_flags: <defaults>
</compile_context>

<pallas_src>
import jax
import jax.numpy as jnp
from jax.experimental import pallas as pl
from jax.experimental.pallas import tpu as pltpu


def _prelu_kernel(alpha_ref, x_ref, o_ref):
    # alpha_ref: (1, 1) scalar in SMEM
    # x_ref / o_ref: (block_rows, lanes) tile in VMEM
    a = alpha_ref[0, 0]
    x = x_ref[...]
    o_ref[...] = jnp.where(x >= 0, x, a * x)


_LANE_CANDIDATES = (4096, 2048, 1024, 512, 256, 128)
_TARGET_TILE_BYTES = 2 * 1024 * 1024  # ~2 MiB/tile -> ~8 MiB resident (in+out, 2x buf)


def _choose_layout(total_elems, dtype_bytes):
    """Pick (lanes, rows, block_rows) for a 128-aligned flat element count."""
    lanes = 128
    for cand in _LANE_CANDIDATES:
        if total_elems % cand == 0:
            lanes = cand
            break
    rows = total_elems // lanes

    rows_per_tile = max(8, _TARGET_TILE_BYTES // (lanes * dtype_bytes))
    rows_per_tile = (rows_per_tile // 8) * 8  # sublane-aligned (multiple of 8)

    if rows < rows_per_tile:
        block_rows = rows          # single block == full row extent (allowed)
    else:
        block_rows = rows_per_tile # multiple of 8; ragged tail handled by cdiv grid
    return lanes, rows, block_rows


def prelu_pallas(x, alpha):
    """x: any shape, alpha: scalar. Returns relu(x) - alpha * relu(-x)."""
    orig_shape = x.shape
    orig_dtype = x.dtype
    total = x.size

    x_flat = x.reshape(-1)
    # Pad only to a 128-lane boundary, and only when genuinely ragged
    # (<= 127 elements; zero-padding is safe since prelu(0) == 0).
    pad = (-total) % 128
    if pad:
        x_flat = jnp.concatenate([x_flat, jnp.zeros((pad,), dtype=orig_dtype)])

    lanes, rows, block_rows = _choose_layout(
        x_flat.size, jnp.dtype(orig_dtype).itemsize)
    x2d = x_flat.reshape(rows, lanes)

    alpha_arr = jnp.asarray(alpha, dtype=orig_dtype).reshape(1, 1)

    grid = (pl.cdiv(rows, block_rows),)

    out2d = pl.pallas_call(
        _prelu_kernel,
        out_shape=jax.ShapeDtypeStruct((rows, lanes), orig_dtype),
        grid_spec=pltpu.PrefetchScalarGridSpec(
            num_scalar_prefetch=0,
            grid=grid,
            in_specs=[
                pl.BlockSpec(memory_space=pltpu.SMEM),               # alpha scalar
                pl.BlockSpec((block_rows, lanes), lambda i: (i, 0)),  # x tile
            ],
            out_specs=pl.BlockSpec((block_rows, lanes), lambda i: (i, 0)),
        ),
        compiler_params=pltpu.CompilerParams(
            dimension_semantics=("parallel",),
        ),
    )(alpha_arr, x2d)

    out_flat = out2d.reshape(-1)
    if pad:
        out_flat = out_flat[:total]
    return out_flat.reshape(orig_shape)


if __name__ == "__main__":
    key = jax.random.PRNGKey(0)
    # NCHW input, matching PyTorch conv-style layout.
    x = jax.random.normal(key, (2, 4, 16, 16), dtype=jnp.float32)

    # Deterministic parameter init, mirroring Parameter(torch.tensor(0.25)).
    alpha = jnp.float32(0.25)

    y = prelu_pallas(x, alpha)
    y = jax.block_until_ready(y)

    # Reference check in plain JAX (same formula as the PyTorch module).
    y_ref = jnp.maximum(x, 0.0) - alpha * jnp.maximum(-x, 0.0)
    assert y.shape == x.shape and y.dtype == x.dtype
    assert jnp.allclose(y, y_ref, atol=1e-6, rtol=1e-6)

    print("KERNEL_OK")
</pallas_src>

<mosaic_0001>
module attributes {stable_mosaic.version = 11 : i64} {
  func.func @_prelu_kernel(%arg0: i32, %arg1: memref<1x1xf32, #tpu.memory_space<smem>>, %arg2: memref<1x2048xf32, #tpu.memory_space<vmem>>, %arg3: memref<1x2048xf32, #tpu.memory_space<vmem>>) attributes {dimension_semantics = [#tpu.dimension_semantics<parallel>], iteration_bounds = array<i64: 1>, scalar_prefetch = 0 : i64, scratch_operands = 0 : i64, tpu.core_type = #tpu.core_type<tc>, window_params = [{transform_indices = @transform_0, window_bounds = array<i64: 1, 1>}, {transform_indices = @transform_1, window_bounds = array<i64: 1, 2048>}, {transform_indices = @transform_2, window_bounds = array<i64: 1, 2048>}]} {
    %c0 = arith.constant 0 : index
    %c0_0 = arith.constant 0 : index
    %0 = memref.load %arg1[%c0, %c0_0] : memref<1x1xf32, #tpu.memory_space<smem>>
    %c0_1 = arith.constant 0 : index
    %c0_2 = arith.constant 0 : index
    %1 = vector.load %arg2[%c0_1, %c0_2] : memref<1x2048xf32, #tpu.memory_space<vmem>>, vector<1x2048xf32>
    %cst = arith.constant 0.000000e+00 : f32
    %2 = vector.broadcast %cst : f32 to vector<1x2048xf32>
    %3 = arith.cmpf oge, %1, %2 : vector<1x2048xf32>
    %4 = vector.broadcast %0 : f32 to vector<1x2048xf32>
    %5 = arith.mulf %4, %1 : vector<1x2048xf32>
    %6 = arith.select %3, %1, %5 : vector<1x2048xi1>, vector<1x2048xf32>
    %c0_3 = arith.constant 0 : index
    %c0_4 = arith.constant 0 : index
    %7 = vector.load %arg3[%c0_3, %c0_4] : memref<1x2048xf32, #tpu.memory_space<vmem>>, vector<1x2048xf32>
    tpu.vector_store %arg3[%c0_3, %c0_4], %6 {strides = array<i32>} : memref<1x2048xf32, #tpu.memory_space<vmem>>, vector<1x2048xf32>,
    return
  }
  func.func @transform_0(%arg0: i32) -> (i32, i32) {
    %c0_i32 = arith.constant 0 : i32
    %c0_i32_0 = arith.constant 0 : i32
    %c0_i32_1 = arith.constant 0 : i32
    return %c0_i32, %c0_i32_0 : i32, i32
  }
  func.func @transform_1(%arg0: i32) -> (i32, i32) {
    %c0_i32 = arith.constant 0 : i32
    %c0_i32_0 = arith.constant 0 : i32
    return %arg0, %c0_i32 : i32, i32
  }
  func.func @transform_2(%arg0: i32) -> (i32, i32) {
    %c0_i32 = arith.constant 0 : i32
    %c0_i32_0 = arith.constant 0 : i32
    return %arg0, %c0_i32 : i32, i32
  }
}

</mosaic_0001>

<bundles_post_ra>
// kernel: tpu_custom_call.1
= control target key start
LH: loop header
LB: loop body
LE: loop exit
PB: predicated region body
PF: predicated region fallthrough
CT: control target
= control target key end

     0   :  { %8 = vsyncpa [#allocation4], 0  ;;  %s146_s0 = inlined_call_operand.<no memory space> [shape: f32[1,1], index: 0, kind: input, shape index: {}]   ;;  %s147_s1 = inlined_call_operand.hbm [shape: f32[1,2048], index: 1, kind: input, shape index: {}]   ;;  %s148_s2 = inlined_call_operand.hbm [shape: f32[1,2048], index: 2, kind: output, shape index: {}]  }
   0x1   :  { %9 = vsyncpa [#allocation5], 0  ;;  %s102_s9 = smov [#allocation3]   ;;  %s54_s13 = scalar_lea.hbm %s147_s1, 256 }
   0x2   :  { %s18_s10 = sshll.u32 %s102_s9, 4  ;;  %p55_p0 = scmp.ne.s32.totalorder %s147_s1, %s54_s13  ;;  %s19_s10 = int_to_ptr.vmem [resolvable:$true] %s18_s10 }
   0x3   :  { %p58_p1 = scmp.lt.u32.totalorder %s54_s13, %s147_s1 }
   0x5   :  { %p60_p2 = pnand %p58_p1, %p55_p0 }
   0x7   :  { %63 = shalt.err (!%p60_p2)
}
   0x8   :  { %s64_s18 = scalar_lea.vmem %s19_s10, 256  ;;  %p69_p4 = scmp.lt.s32.totalorder %s19_s10, %s19_s10 }
   0x9   :  { %p65_p3 = scmp.ne.s32.totalorder %s19_s10, %s64_s18  ;;  %p70_p5 = scmp.lt.s32.totalorder %s64_s18, %s64_s18 }
   0xb   :  { %p71_p6 = por %p70_p5, %p69_p4 }
   0xd   :  { %p72_p7 = pnand %p71_p6, %p65_p3 }
   0xf   :  { %75 = shalt.err (!%p72_p7)
}
  0x10   :  { %21 = dma.hbm_to_vmem [thread:$0]  %s147_s1, 256, %s19_s10, [#allocation4]  }
  0x11   :  { %98 = dma.done.wait [#allocation4], 256  }
  0x12   :  { %99 = vsyncadd [#allocation4], 4294967040  ;;  %v30_v0 = vstv %s146_s0  ;;  %s103_s23 = smov [#allocation6]   ;;  %v26_v1 = vld [vmem:[#allocation3] sm:$0xff]  ;;  %v27_v2 = vld [vmem:[#allocation3 + $0x8] sm:$0xff] }
  0x13   :  { %s43_s24 = sshll.u32 %s103_s23, 4  ;;  %vm28_vm0 = vcmp.ge.f32.partialorder %v26_v1, 0.0  ;;  %v31_v3 = vmul.f32 %v30_v0, %v26_v1  ;;  %vm29_vm1 = vcmp.ge.f32.partialorder %v27_v2, 0.0  ;;  %v32_v4 = vmul.f32 %v30_v0, %v27_v2  ;;  %s44_s24 = int_to_ptr.vmem [resolvable:$true] %s43_s24 }
  0x14   :  { %s76_s1 = scalar_lea.vmem %s44_s24, 256  ;;  %p81_p9 = scmp.lt.s32.totalorder %s44_s24, %s44_s24 }
  0x15   :  { %v33_v5 = vsel %vm28_vm0, %v26_v1, %v31_v3  ;;  %v34_v6 = vsel %vm29_vm1, %v27_v2, %v32_v4  ;;  %p77_p8 = scmp.ne.s32.totalorder %s44_s24, %s76_s1  ;;  %p82_p10 = scmp.lt.s32.totalorder %s76_s1, %s76_s1 }
  0x16   :  { %35 = vst [vmem:[#allocation6] sm:$0xff] %v33_v5  ;;  %36 = vst [vmem:[#allocation6 + $0x8] sm:$0xff] %v34_v6 }
  0x17   :  { %p83_p11 = por %p82_p10, %p81_p9 }
  0x19   :  { %p84_p12 = pnand %p83_p11, %p77_p8 }
  0x1b   :  { %87 = shalt.err (!%p84_p12)
}
  0x1c   :  { %s88_s26 = scalar_lea.hbm %s148_s2, 256 }
  0x1d   :  { %p89_p13 = scmp.ne.s32.totalorder %s148_s2, %s88_s26  ;;  %p92_p0 = scmp.lt.u32.totalorder %s88_s26, %s148_s2 }
  0x1f   :  { %p94_p1 = pnand %p92_p0, %p89_p13 }
  0x21   :  { %97 = shalt.err (!%p94_p1)
}
  0x22   :  { %46 = dma.vmem_to_hbm [thread:$0]  %s44_s24, 256, %s148_s2, [#allocation5]  }
  0x23   :  { %100 = dma.done.wait [#allocation5], 256  }
  0x24   :  { %101 = vsyncadd [#allocation5], 4294967040 }
  0x25   :  { %50 = vsyncpa [#allocation4], 1 }
  0x26   :  { %51 = vsyncpa [#allocation5], 1 }

</bundles_post_ra>
